<compile_context>
chip_gen: v7x
topology: tpu7x:2x2x1
jax: 0.10.0
libtpu: 0.0.40
codegen_flags: <defaults>
</compile_context>

<pallas_src>
import jax
import jax.numpy as jnp
from jax.experimental import pallas as pl
from jax.experimental.pallas import tpu as pltpu


def _round_up(x, m):
    return ((x + m - 1) // m) * m


# Sublane row-alignment per input itemsize (f32 -> 8, bf16 -> 16, int8 -> 32).
_SUBLANE_ALIGN = {4: 8, 2: 16, 1: 32}


def _pick_tile_q(num_queries, num_classes, num_gt, in_bytes, align):
    """Largest query tile that fits a conservative VMEM budget."""
    # Per-row bytes: double-buffered input tile (in its dtype) + the f32
    # temporaries (x upcast, exp(x-m)) + bf16 hi/lo matmul operands + the
    # double-buffered f32 output rows.
    per_row = num_classes * (2 * in_bytes + 12) + 8 * num_gt
    # Stay well inside the smallest scoped-VMEM default (v5e: 16 MiB); also
    # reserve room for the VMEM-resident (C, G) bf16 one-hot.
    budget = max(12 * 1024 * 1024 - 2 * num_classes * num_gt, 1)
    max_rows = max(align, (budget // per_row) // align * align)
    tile = min(512, max_rows, _round_up(num_queries, align))
    tile = max(tile, align)
    # Keep the number of grid steps even when there is more than one, so a
    # two-TensorCore chip (v7x) splits the "parallel" query axis evenly; on
    # single-core chips this only shaves a few rows off the tile.
    grid = pl.cdiv(num_queries, tile)
    if grid > 1 and grid % 2 == 1:
        tile = max(align, _round_up(pl.cdiv(num_queries, grid + 1), align))
    return tile


def _ce_cost_kernel(w_ref, logits_ref, onehot_ref, out_ref):
    # w_ref:      (1, 1)        f32   SMEM scalar (the cost weight)
    # logits_ref: (tile_q, C)   input dtype, full class row per query
    # onehot_ref: (C, G)        bf16 {0, 1} selection matrix (VMEM-resident)
    # out_ref:    (tile_q, G)   f32 cost tile
    x = logits_ref[...].astype(jnp.float32)

    # Stable softmax numerator / denominator (one exp per logit; no log, no
    # second exp - the normalization is a per-row reciprocal below).
    m = jnp.max(x, axis=-1, keepdims=True)                      # (tile_q, 1)
    e = jnp.exp(x - m)                                          # (tile_q, C)
    s = jnp.sum(e, axis=-1, keepdims=True)                      # (tile_q, 1)

    # Gather exp(x - m) at the gt-label columns as an MXU matmul against the
    # one-hot.  Split the f32 LHS into bf16 hi/lo so two cheap bf16 passes
    # reproduce the f32 values exactly (one-hot entries are exact in bf16).
    onehot = onehot_ref[...]                                    # (C, G) bf16
    e_hi = e.astype(jnp.bfloat16)
    e_lo = (e - e_hi.astype(jnp.float32)).astype(jnp.bfloat16)
    eg = (jnp.dot(e_hi, onehot, preferred_element_type=jnp.float32)
          + jnp.dot(e_lo, onehot, preferred_element_type=jnp.float32))

    # cost = -w * softmax(x)[:, gt] = (-w / s) * exp(x_gt - m)
    scale = (-w_ref[0, 0]) * pl.reciprocal(s, approx=False)     # (tile_q, 1)
    out_ref[...] = (eg * scale).astype(out_ref.dtype)


def cross_entropy_cost(pred_logits, gt_labels, *, weight=1.0, tile_q=None):
    """pred_logits: (num_queries, num_classes) float (f32 or bf16)
       gt_labels:   (num_gt,) int32
       returns:     (num_queries, num_gt) float32 cost matrix."""
    num_queries, num_classes = pred_logits.shape
    num_gt = int(gt_labels.shape[0])
    out_dtype = jnp.float32

    if num_gt == 0:  # no ground truth: empty cost matrix, nothing to launch
        return jnp.zeros((num_queries, 0), dtype=out_dtype)

    in_bytes = jnp.dtype(pred_logits.dtype).itemsize
    align = _SUBLANE_ALIGN.get(in_bytes, 8)

    # (C, G) one-hot selection matrix via broadcast-compare (no minor-dim
    # gather op).  bf16 {0,1} is exact and halves its VMEM footprint.
    class_ids = jax.lax.broadcasted_iota(jnp.int32, (num_classes, num_gt), 0)
    onehot = (class_ids == gt_labels[None, :].astype(jnp.int32)
              ).astype(jnp.bfloat16)

    if tile_q is None:
        tile_q = _pick_tile_q(num_queries, num_classes, num_gt, in_bytes, align)
    tile_q = max(align,
                 _round_up(min(tile_q, _round_up(num_queries, align)), align))
    grid_q = pl.cdiv(num_queries, tile_q)

    w_arr = jnp.full((1, 1), weight, dtype=jnp.float32)

    cost_est = pl.CostEstimate(
        flops=4 * num_queries * num_classes * num_gt
              + 6 * num_queries * num_classes,
        transcendentals=num_queries * num_classes,
        bytes_accessed=(num_queries * num_classes * in_bytes
                        + num_classes * num_gt * 2
                        + num_queries * num_gt * 4 + 4),
    )

    return pl.pallas_call(
        _ce_cost_kernel,
        out_shape=jax.ShapeDtypeStruct((num_queries, num_gt), out_dtype),
        grid_spec=pltpu.PrefetchScalarGridSpec(
            num_scalar_prefetch=0,
            grid=(grid_q,),
            in_specs=[
                pl.BlockSpec(memory_space=pltpu.MemorySpace.SMEM),        # weight
                pl.BlockSpec((tile_q, num_classes), lambda i: (i, 0)),    # logits
                pl.BlockSpec((num_classes, num_gt), lambda i: (0, 0)),    # one-hot
            ],
            out_specs=pl.BlockSpec((tile_q, num_gt), lambda i: (i, 0)),
        ),
        compiler_params=pltpu.CompilerParams(
            dimension_semantics=("parallel",)),
        cost_estimate=cost_est,
    )(w_arr, pred_logits, onehot)


def _reference(pred_logits, gt_labels, weight=1.0):
    out_prob = jax.nn.softmax(pred_logits.astype(jnp.float32), axis=-1)
    return -out_prob[:, gt_labels] * weight


if __name__ == "__main__":
    key = jax.random.PRNGKey(0)
    k1, k2 = jax.random.split(key)

    num_queries, num_classes, num_gt = 16, 32, 8
    pred_logits = jax.random.normal(
        k1, (num_queries, num_classes), dtype=jnp.float32) * 2.0
    gt_labels = jax.random.randint(
        k2, (num_gt,), 0, num_classes, dtype=jnp.int32)

    # f32 logits, unit weight.
    cost = jax.block_until_ready(
        cross_entropy_cost(pred_logits, gt_labels, weight=1.0))
    ref = _reference(pred_logits, gt_labels, weight=1.0)
    assert cost.shape == (num_queries, num_gt)
    assert jnp.allclose(cost, ref, atol=1e-5, rtol=1e-5)

    # f32 logits, non-unit weight (runtime SMEM scalar, no recompile).
    cost_w = jax.block_until_ready(
        cross_entropy_cost(pred_logits, gt_labels, weight=2.5))
    ref_w = _reference(pred_logits, gt_labels, weight=2.5)
    assert jnp.allclose(cost_w, ref_w, atol=1e-5, rtol=1e-5)

    # bf16 logits (halved input DMA, 16-row alignment path); reference upcasts
    # the same bf16 values so both sides see identical inputs.
    logits_bf16 = pred_logits.astype(jnp.bfloat16)
    cost_bf = jax.block_until_ready(
        cross_entropy_cost(logits_bf16, gt_labels, weight=1.0))
    ref_bf = _reference(logits_bf16, gt_labels, weight=1.0)
    assert jnp.allclose(cost_bf, ref_bf, atol=1e-5, rtol=1e-5)

    print("KERNEL_OK")
</pallas_src>

<mosaic_0001>
module attributes {stable_mosaic.version = 11 : i64} {
  func.func @_ce_cost_kernel(%arg0: i32, %arg1: memref<1x1xf32, #tpu.memory_space<smem>>, %arg2: memref<16x32xf32, #tpu.memory_space<vmem>>, %arg3: memref<32x8xbf16, #tpu.memory_space<vmem>>, %arg4: memref<16x8xf32, #tpu.memory_space<vmem>>) attributes {dimension_semantics = [#tpu.dimension_semantics<parallel>], iteration_bounds = array<i64: 1>, scalar_prefetch = 0 : i64, scratch_operands = 0 : i64, tpu.core_type = #tpu.core_type<tc>, window_params = [{transform_indices = @transform_0, window_bounds = array<i64: 1, 1>}, {transform_indices = @transform_1, window_bounds = array<i64: 16, 32>}, {pipeline_mode = #tpu.pipeline_mode<synchronous>, transform_indices = @transform_2, window_bounds = array<i64: 32, 8>}, {transform_indices = @transform_3, window_bounds = array<i64: 16, 8>}]} {
    %c0 = arith.constant 0 : index
    %c0_0 = arith.constant 0 : index
    %0 = vector.load %arg2[%c0, %c0_0] : memref<16x32xf32, #tpu.memory_space<vmem>>, vector<16x32xf32>
    %cst = arith.constant dense<0xFF800000> : vector<16xf32>
    %1 = vector.multi_reduction <maximumf>, %0, %cst [1] : vector<16x32xf32> to vector<16xf32>
    %2 = vector.shape_cast %1 : vector<16xf32> to vector<16x1xf32>
    %3 = vector.broadcast %2 : vector<16x1xf32> to vector<16x32xf32>
    %4 = arith.subf %0, %3 : vector<16x32xf32>
    %5 = math.exp %4 : vector<16x32xf32>
    %cst_1 = arith.constant dense<0.000000e+00> : vector<16xf32>
    %6 = vector.multi_reduction <add>, %5, %cst_1 [1] : vector<16x32xf32> to vector<16xf32>
    %7 = vector.shape_cast %6 : vector<16xf32> to vector<16x1xf32>
    %c0_2 = arith.constant 0 : index
    %c0_3 = arith.constant 0 : index
    %8 = vector.load %arg3[%c0_2, %c0_3] : memref<32x8xbf16, #tpu.memory_space<vmem>>, vector<32x8xbf16>
    %9 = arith.truncf %5 : vector<16x32xf32> to vector<16x32xbf16>
    %10 = arith.extf %9 : vector<16x32xbf16> to vector<16x32xf32>
    %11 = arith.subf %5, %10 : vector<16x32xf32>
    %12 = arith.truncf %11 : vector<16x32xf32> to vector<16x32xbf16>
    %cst_4 = arith.constant dense<0.000000e+00> : vector<16x8xf32>
    %13 = tpu.matmul %9, %8, %cst_4 {dimension_numbers = #tpu.dot_dimension_numbers<[1], [0], [0], [1], [0, 0, 1, 1], [], []>} : vector<16x32xbf16>, vector<32x8xbf16>, vector<16x8xf32> -> vector<16x8xf32>
    %cst_5 = arith.constant dense<0.000000e+00> : vector<16x8xf32>
    %14 = tpu.matmul %12, %8, %cst_5 {dimension_numbers = #tpu.dot_dimension_numbers<[1], [0], [0], [1], [0, 0, 1, 1], [], []>} : vector<16x32xbf16>, vector<32x8xbf16>, vector<16x8xf32> -> vector<16x8xf32>
    %15 = arith.addf %13, %14 : vector<16x8xf32>
    %c0_6 = arith.constant 0 : index
    %c0_7 = arith.constant 0 : index
    %16 = memref.load %arg1[%c0_6, %c0_7] : memref<1x1xf32, #tpu.memory_space<smem>>
    %cst_8 = arith.constant 0.000000e+00 : f32
    %17 = arith.subf %cst_8, %16 : f32
    %18 = tpu.reciprocal %7 : vector<16x1xf32> -> vector<16x1xf32>
    %19 = vector.broadcast %17 : f32 to vector<16x1xf32>
    %20 = arith.mulf %19, %18 : vector<16x1xf32>
    %21 = vector.broadcast %20 : vector<16x1xf32> to vector<16x8xf32>
    %22 = arith.mulf %15, %21 : vector<16x8xf32>
    %c0_9 = arith.constant 0 : index
    %c0_10 = arith.constant 0 : index
    %23 = vector.load %arg4[%c0_9, %c0_10] : memref<16x8xf32, #tpu.memory_space<vmem>>, vector<16x8xf32>
    tpu.vector_store %arg4[%c0_9, %c0_10], %22 {strides = array<i32>} : memref<16x8xf32, #tpu.memory_space<vmem>>, vector<16x8xf32>,
    return
  }
  func.func @transform_0(%arg0: i32) -> (i32, i32) {
    %c0_i32 = arith.constant 0 : i32
    %c0_i32_0 = arith.constant 0 : i32
    %c0_i32_1 = arith.constant 0 : i32
    return %c0_i32, %c0_i32_0 : i32, i32
  }
  func.func @transform_1(%arg0: i32) -> (i32, i32) {
    %c0_i32 = arith.constant 0 : i32
    %c0_i32_0 = arith.constant 0 : i32
    return %arg0, %c0_i32 : i32, i32
  }
  func.func @transform_2(%arg0: i32) -> (i32, i32) {
    %c0_i32 = arith.constant 0 : i32
    %c0_i32_0 = arith.constant 0 : i32
    %c0_i32_1 = arith.constant 0 : i32
    return %c0_i32, %c0_i32_0 : i32, i32
  }
  func.func @transform_3(%arg0: i32) -> (i32, i32) {
    %c0_i32 = arith.constant 0 : i32
    %c0_i32_0 = arith.constant 0 : i32
    return %arg0, %c0_i32 : i32, i32
  }
}

</mosaic_0001>

<bundles_post_ra>
// kernel: tpu_custom_call.1
= control target key start
LH: loop header
LB: loop body
LE: loop exit
PB: predicated region body
PF: predicated region fallthrough
CT: control target
= control target key end

     0   :  { %vm18_vm0 = vcmask 261120   ;;  %v203_v4 = vmov 0.0   ;;  %vm204_vm1 = vmmov 0   ;;  %vm156_vm2 = vcmask 64512   ;;  %s252_s1 = inlined_call_operand.vmem [shape: f32[16,32], index: 1, kind: input, shape index: {}]   ;;  %s253_s2 = inlined_call_operand.vmem [shape: bf16[32,8], index: 2, kind: input, shape index: {}]   ;;  %s254_s0 = inlined_call_operand.<no memory space> [shape: f32[1,1], index: 0, kind: input, shape index: {}]   ;;  %s255_s3 = inlined_call_operand.vmem [shape: f32[16,8], index: 3, kind: output, shape index: {}]  }
   0x1   :  { %v16_v0 = vld [vmem:[%s252_s1] sm:$0xff]  ;;  %v17_v1 = vld [vmem:[%s252_s1 + $0x8] sm:$0xff]  ;;  %181 = vmatprep.subr.bf16.mxu0 %v203_v4  ;;  %173 = vmatprep.subr.bf16.mxu1 %v203_v4  ;;  %s148_s20 = ssub.f32 0.0, %s254_s0 }
   0x2   :  { %v19_v2 = vsel %vm18_vm0, %v16_v0, -inf  ;;  %v22_v3 = vsel %vm18_vm0, %v17_v1, -inf  ;;  %v193_v5 = vld [vmem:[%s253_s2] sm:$0xff]   ;;  %v194_v6 = vld [vmem:[%s253_s2 + $0x8] sm:$0xff]   ;;  %185 = vmatprep.mubr.msk.bf16.mxu0 %vm204_vm1, %v203_v4  ;;  %177 = vmatprep.mubr.msk.bf16.mxu1 %vm204_vm1, %v203_v4 }
   0x3   :  { %20 = vmax.xlane.f32.xlu0 %v19_v2  ;;  %182 = vmatpush3.bf16.msra.mxu0 %v193_v5  ;;  %v151_v30 = vstv %s148_s20 }
   0x4   :  { %174 = vmatpush3.bf16.msra.mxu1 %v193_v5  ;;  %183 = vmatprep.subr.bf16.mxu0 %v203_v4 }
   0x5   :  { %175 = vmatprep.subr.bf16.mxu1 %v203_v4 }
   0x7   :  { %23 = vmax.xlane.f32.xlu0 %v22_v3  ;;  %184 = vmatpush3.bf16.msra.mxu0 %v194_v6 }
   0x8   :  { %176 = vmatpush3.bf16.msra.mxu1 %v194_v6 }
  0x90   :  { %v21_v7 = vpop.xlane.xlu0 %20 }
  0x91   :  { %v25_v8 = vsub.f32 %v16_v0, %v21_v7 }
  0x93   :  { %v27_v9 = vmul.f32 1.442695, %v25_v8 }
  0x94   :  { %v24_v10 = vpop.xlane.xlu0 %23 }
  0x95   :  { %195 = vpow2.f32 %v27_v9  ;;  %v26_v11 = vsub.f32 %v17_v1, %v24_v10 }
  0x97   :  { %v29_v12 = vmul.f32 1.442695, %v26_v11 }
  0x99   :  { %197 = vpow2.f32 %v29_v12 }
  0x9f   :  { %v196_v13 = vpop.eup %195 }
  0xa0   :  { %v31_v14 = vsel %vm18_vm0, %v196_v13, 0.0 }
  0xa1   :  { %32 = vadd.xlane.f32.xlu1 %v31_v14 }
  0xa3   :  { %v198_v15 = vpop.eup %197 }
  0xa4   :  { %v34_v16 = vsel %vm18_vm0, %v198_v15, 0.0  ;;  %v41_v17 = vpack.c.bf16 %v198_v15, %v196_v13 }
  0xa5   :  { %35 = vadd.xlane.f32.xlu1 %v34_v16 }
  0xa6   :  { %186 = vmatmul.mubr.msk.bf16.vlgmr.msra.gmra.mrb[0].mxu0 %vm18_vm0, %v41_v17  ;;  %v42_v18 = vunpack.c.l.bf16 %v41_v17  ;;  %v43_v19 = vunpack.c.h.bf16 %v41_v17 }
  0xa8   :  { %v44_v20 = vsub.f32 %v196_v13, %v42_v18  ;;  %v45_v21 = vsub.f32 %v198_v15, %v43_v19 }
  0xaa   :  { %v46_v22 = vpack.c.bf16 %v45_v21, %v44_v20 }
  0xac   :  { %178 = vmatmul.mubr.msk.bf16.vlgmr.msra.gmra.mrb[0].mxu1 %vm18_vm0, %v46_v22 }
 0x12e   :  { %v33_v23 = vpop.xlane.xlu1 %32 }
 0x12f   :  { %199 = vrcp.f32 %v33_v23 }
 0x132   :  { %v36_v24 = vpop.xlane.xlu1 %35 }
 0x133   :  { %201 = vrcp.f32 %v36_v24 }
 0x139   :  { %v200_v29 = vpop.eup %199 }
 0x13a   :  { %v152_v34 = vmul.f32 %v200_v29, %v151_v30 }
 0x13d   :  { %v202_v31 = vpop.eup %201 }
 0x13e   :  { %v153_v39 = vmul.f32 %v202_v31, %v151_v30 }
 0x179   :  { %v140_v25 = vpop.f32.mrb[0].mxu0 }
 0x17a   :  { %v187_v26 = vpop.f32.mrb[1].mxu0 }
 0x17b   :  { %v143_v27 = vpop.f32.mrb[2].mxu0 }
 0x17c   :  { %v188_v28 = vpop.f32.mrb[3].mxu0 }
 0x17f   :  { %v96_v32 = vpop.f32.mrb[0].mxu1 }
 0x180   :  { %v141_v33 = vadd.f32 %v140_v25, %v96_v32  ;;  %v179_v35 = vpop.f32.mrb[1].mxu1 }
 0x181   :  { %v99_v36 = vpop.f32.mrb[2].mxu1 }
 0x182   :  { %v154_v37 = vmul.f32 %v152_v34, %v141_v33  ;;  %v144_v38 = vadd.f32 %v143_v27, %v99_v36  ;;  %v180_v40 = vpop.f32.mrb[3].mxu1 }
 0x184   :  { %157 = vst.msk [vmem:[%s255_s3] sm:$0xff] %vm156_vm2, %v154_v37  ;;  %v155_v41 = vmul.f32 %v153_v39, %v144_v38 }
 0x186   :  { %158 = vst.msk [vmem:[%s255_s3 + $0x8] sm:$0xff] %vm156_vm2, %v155_v41 }

</bundles_post_ra>
